<compile_context>
chip_gen: v7x
topology: tpu7x:2x2x1
jax: 0.10.0
libtpu: 0.0.40
codegen_flags: <defaults>
</compile_context>

<pallas_src>
import functools
from typing import List

import numpy as np
import jax
import jax.numpy as jnp
from jax.experimental import pallas as pl
from jax.experimental.pallas import tpu as pltpu

LANE = 128  # TPU vreg lane width


def _round_up(x: int, m: int) -> int:
    return (x + m - 1) // m * m


def _usable_vmem_bytes() -> int:
    """Generation-aware usable VMEM (leave ~25% headroom for compiler scratch)."""
    try:
        cap = int(pltpu.get_tpu_info().vmem_capacity_bytes)
    except Exception:
        cap = 64 << 20  # conservative (v7x per-TC) fallback
    return (cap * 3) // 4


# ----------------------------------------------------------------------------
# Deterministic Kaiming-uniform init (replicates the PyTorch module's init).
# ----------------------------------------------------------------------------
def kaiming_uniform(shape, a=np.sqrt(5)):
    # shape = (out, in) like nn.Linear.weight; fan_in mode, leaky_relu gain.
    fan_in = shape[1]
    gain = np.sqrt(2.0 / (1.0 + a ** 2))
    std = gain / np.sqrt(fan_in)
    bound = np.sqrt(3.0) * std
    return np.random.uniform(-bound, bound, size=shape).astype(np.float32)


def make_mlp_params(in_size: int, layer_sizes: List[int],
                    compute_dtype=jnp.bfloat16):
    """Per-layer (W^T, b).

    W^T is (K, N_pad) in `compute_dtype` (bf16 MXU inputs); the first layer
    keeps the true K = in_size (x is consumed unpadded), later layers pad K to
    the previous layer's 128-padded width.  N is zero-padded to a 128-lane
    multiple so stores stay lane-dense; zero padding never contributes to real
    outputs.  b is (1, N_pad) float32 (epilogue stays f32).
    On v7x, compute_dtype could be an fp8 type for more VMEM headroom
    (gate per-generation; not enabled by default).
    """
    params = []
    m = in_size
    for idx, n in enumerate(layer_sizes):
        W = kaiming_uniform((n, m))                  # (out, in), like nn.Linear
        B = np.zeros((n,), dtype=np.float32)
        m_pad = m if idx == 0 else _round_up(m, LANE)
        n_pad = _round_up(n, LANE)
        Wt = np.zeros((m_pad, n_pad), dtype=np.float32)
        Wt[:m, :n] = W.T
        Bp = np.zeros((1, n_pad), dtype=np.float32)
        Bp[0, :n] = B
        params.append((jnp.asarray(Wt, dtype=compute_dtype), jnp.asarray(Bp)))
        m = n
    return params


# ----------------------------------------------------------------------------
# Fused MLP kernel: statically unrolled loop over layers; activations live in
# VMEM/vregs and never round-trip through HBM between layers.
# ----------------------------------------------------------------------------
def _fused_mlp_kernel(x_ref, *refs, num_layers, sigmoid_idx, compute_dtype):
    o_ref = refs[-1]
    h = x_ref[...].astype(compute_dtype)       # (tb, K0), cast f32 -> bf16 in VMEM
    for i in range(num_layers):
        w = refs[2 * i][...]                   # (Ki, Ni_pad), compute_dtype (resident)
        b = refs[2 * i + 1][...]               # (1, Ni_pad), f32 (resident)
        acc = jnp.dot(h, w, preferred_element_type=jnp.float32)  # MXU, f32 acc
        acc = acc + b                                            # f32 epilogue
        if i == sigmoid_idx:
            # Exact sigmoid for the prediction layer (exp -> EUP, exact divide).
            acc = 1.0 / (1.0 + jnp.exp(-acc))
        else:
            acc = jnp.maximum(acc, 0.0)
        if i + 1 < num_layers:
            h = acc.astype(compute_dtype)
        else:
            o_ref[...] = acc.astype(o_ref.dtype)


# ----------------------------------------------------------------------------
# Wrapper.  Matches benchmark/recsys/dlrmv2/dlrm_model.py::MLP semantics:
# every Linear is followed by ReLU, except the layer at index `sigmoid_idx`
# which is followed by Sigmoid.  sigmoid_idx < 0 (the module default -1) means
# "no sigmoid anywhere" (it is NOT Python's last-element convention).
# ----------------------------------------------------------------------------
def mlp_forward(x, params, out_size: int, sigmoid_idx: int = -1, *,
                compute_dtype=jnp.bfloat16, out_dtype=jnp.float32,
                max_block_b: int = 1024):
    B, in_features = x.shape
    num_layers = len(params)
    assert params[0][0].shape[0] == in_features, "first-layer K must match x"
    n_last_pad = params[-1][0].shape[1]
    if sigmoid_idx is None or sigmoid_idx < 0:
        sigmoid_idx = -1  # no layer matches -> ReLU everywhere (module default)

    in_itemsize = jnp.dtype(x.dtype).itemsize
    out_itemsize = jnp.dtype(out_dtype).itemsize
    bytes_weights = sum(int(w.size) * w.dtype.itemsize +
                        int(bb.size) * bb.dtype.itemsize for w, bb in params)
    max_hidden = max(w.shape[1] for w, _ in params)

    # --- VMEM-budget-driven batch tile --------------------------------------
    usable = _usable_vmem_bytes()
    # Per-row cost: double-buffered x tile + double-buffered out tile +
    # generous f32 activation working set (weights counted once: resident).
    per_row = (2 * in_features * in_itemsize
               + 2 * n_last_pad * out_itemsize
               + 3 * max_hidden * 4)
    budget_rows = max((usable - bytes_weights - (2 << 20)) // per_row, 16)
    tb = int(min(max_block_b, budget_rows, _round_up(B, 16)))
    tb = max(16, (tb // 16) * 16)              # bf16 vreg tile is (16, 128)
    # v7x megacore: make sure the parallel grid axis has >= 2 steps.
    if pl.cdiv(B, tb) == 1 and B > 16:
        tb = max(16, _round_up(pl.cdiv(B, 2), 16))

    grid = (pl.cdiv(B, tb),)                   # no batch padding; OOB rows of
    # the last tile read unspecified data and their output rows are dropped.

    resident = pl.BlockSpec(memory_space=pltpu.MemorySpace.VMEM)  # single copy
    in_specs = [pl.BlockSpec((tb, in_features), lambda i: (i, 0))]
    flat_inputs = [x]
    for (w_t, b) in params:
        in_specs += [resident, resident]
        flat_inputs += [w_t, b]
    out_specs = pl.BlockSpec((tb, n_last_pad), lambda i: (i, 0))  # lane-dense

    # --- VMEM limit (weights once + pipelined I/O tiles + activation slack) --
    need = (bytes_weights
            + 2 * tb * in_features * in_itemsize
            + 2 * tb * n_last_pad * out_itemsize
            + 4 * tb * max_hidden * 4
            + (4 << 20))
    vmem_limit = int(min(max(need, 8 << 20), usable))

    flops = 2 * B * sum(w.shape[0] * w.shape[1] for w, _ in params)
    transcendentals = (B * params[sigmoid_idx][0].shape[1]
                       if 0 <= sigmoid_idx < num_layers else 0)
    bytes_accessed = (B * in_features * in_itemsize + bytes_weights
                      + B * n_last_pad * out_itemsize)

    kernel = functools.partial(_fused_mlp_kernel,
                               num_layers=num_layers,
                               sigmoid_idx=sigmoid_idx,
                               compute_dtype=compute_dtype)

    out_padded = pl.pallas_call(
        kernel,
        out_shape=jax.ShapeDtypeStruct((B, n_last_pad), out_dtype),
        grid=grid,
        in_specs=in_specs,
        out_specs=out_specs,
        compiler_params=pltpu.CompilerParams(
            dimension_semantics=("parallel",),
            vmem_limit_bytes=vmem_limit),
        cost_estimate=pl.CostEstimate(flops=int(flops),
                                      transcendentals=int(transcendentals),
                                      bytes_accessed=int(bytes_accessed)),
    )(*flat_inputs)

    return out_padded[:, :out_size]


# ----------------------------------------------------------------------------
# Pure-JAX reference mirroring the kernel's bf16-matmul / f32-epilogue math.
# ----------------------------------------------------------------------------
def mlp_ref(x, params, out_size: int, sigmoid_idx: int = -1,
            compute_dtype=jnp.bfloat16):
    h = x.astype(compute_dtype)
    for i, (w_t, b) in enumerate(params):
        acc = jnp.dot(h, w_t, preferred_element_type=jnp.float32) + b
        if i == sigmoid_idx:
            acc = jax.nn.sigmoid(acc)
        else:
            acc = jnp.maximum(acc, 0.0)
        h = acc.astype(compute_dtype) if i + 1 < len(params) else acc
    return h[:, :out_size]


if __name__ == "__main__":
    np.random.seed(0)

    batch = 8
    in_size = 32
    layer_sizes = [64, 32, 16]

    key = jax.random.PRNGKey(0)
    x = jax.random.normal(key, (batch, in_size), dtype=jnp.float32)

    params = make_mlp_params(in_size, layer_sizes)

    # Default module behaviour: sigmoid=-1 -> every layer followed by ReLU.
    out = jax.block_until_ready(mlp_forward(x, params, layer_sizes[-1],
                                            sigmoid_idx=-1))
    ref = mlp_ref(x, params, layer_sizes[-1], sigmoid_idx=-1)
    assert out.shape == (batch, layer_sizes[-1])
    np.testing.assert_allclose(np.asarray(out), np.asarray(ref),
                               rtol=2e-2, atol=2e-2)

    # DLRM over-arch style: sigmoid on the last layer.
    sig = len(layer_sizes) - 1
    out_s = jax.block_until_ready(mlp_forward(x, params, layer_sizes[-1],
                                              sigmoid_idx=sig))
    ref_s = mlp_ref(x, params, layer_sizes[-1], sigmoid_idx=sig)
    np.testing.assert_allclose(np.asarray(out_s), np.asarray(ref_s),
                               rtol=2e-2, atol=2e-2)

    print("KERNEL_OK")
</pallas_src>

<mosaic_0001>
module attributes {stable_mosaic.version = 11 : i64} {
  func.func @_fused_mlp_kernel(%arg0: i32, %arg1: memref<16x32xf32, #tpu.memory_space<vmem>>, %arg2: memref<32x128xbf16, #tpu.memory_space<vmem>>, %arg3: memref<1x128xf32, #tpu.memory_space<vmem>>, %arg4: memref<128x128xbf16, #tpu.memory_space<vmem>>, %arg5: memref<1x128xf32, #tpu.memory_space<vmem>>, %arg6: memref<128x128xbf16, #tpu.memory_space<vmem>>, %arg7: memref<1x128xf32, #tpu.memory_space<vmem>>, %arg8: memref<16x128xf32, #tpu.memory_space<vmem>>) attributes {dimension_semantics = [#tpu.dimension_semantics<parallel>], iteration_bounds = array<i64: 1>, scalar_prefetch = 0 : i64, scratch_operands = 0 : i64, tpu.core_type = #tpu.core_type<tc>, window_params = [{transform_indices = @transform_0, window_bounds = array<i64: 16, 32>}, {pipeline_mode = #tpu.pipeline_mode<synchronous>, transform_indices = @transform_1, window_bounds = array<i64: 32, 128>}, {pipeline_mode = #tpu.pipeline_mode<synchronous>, transform_indices = @transform_2, window_bounds = array<i64: 1, 128>}, {pipeline_mode = #tpu.pipeline_mode<synchronous>, transform_indices = @transform_3, window_bounds = array<i64: 128, 128>}, {pipeline_mode = #tpu.pipeline_mode<synchronous>, transform_indices = @transform_4, window_bounds = array<i64: 1, 128>}, {pipeline_mode = #tpu.pipeline_mode<synchronous>, transform_indices = @transform_5, window_bounds = array<i64: 128, 128>}, {pipeline_mode = #tpu.pipeline_mode<synchronous>, transform_indices = @transform_6, window_bounds = array<i64: 1, 128>}, {transform_indices = @transform_7, window_bounds = array<i64: 16, 128>}]} {
    %c0 = arith.constant 0 : index
    %c0_0 = arith.constant 0 : index
    %0 = vector.load %arg1[%c0, %c0_0] : memref<16x32xf32, #tpu.memory_space<vmem>>, vector<16x32xf32>
    %1 = arith.truncf %0 : vector<16x32xf32> to vector<16x32xbf16>
    %c0_1 = arith.constant 0 : index
    %c0_2 = arith.constant 0 : index
    %2 = vector.load %arg2[%c0_1, %c0_2] : memref<32x128xbf16, #tpu.memory_space<vmem>>, vector<32x128xbf16>
    %c0_3 = arith.constant 0 : index
    %c0_4 = arith.constant 0 : index
    %3 = vector.load %arg3[%c0_3, %c0_4] : memref<1x128xf32, #tpu.memory_space<vmem>>, vector<1x128xf32>
    %cst = arith.constant dense<0.000000e+00> : vector<16x128xf32>
    %4 = tpu.matmul %1, %2, %cst {dimension_numbers = #tpu.dot_dimension_numbers<[1], [0], [0], [1], [0, 0, 1, 1], [], []>} : vector<16x32xbf16>, vector<32x128xbf16>, vector<16x128xf32> -> vector<16x128xf32>
    %5 = vector.broadcast %3 : vector<1x128xf32> to vector<16x128xf32>
    %6 = arith.addf %4, %5 : vector<16x128xf32>
    %cst_5 = arith.constant 0.000000e+00 : f32
    %7 = vector.broadcast %cst_5 : f32 to vector<16x128xf32>
    %8 = arith.maximumf %6, %7 : vector<16x128xf32>
    %9 = arith.truncf %8 : vector<16x128xf32> to vector<16x128xbf16>
    %c0_6 = arith.constant 0 : index
    %c0_7 = arith.constant 0 : index
    %10 = vector.load %arg4[%c0_6, %c0_7] : memref<128x128xbf16, #tpu.memory_space<vmem>>, vector<128x128xbf16>
    %c0_8 = arith.constant 0 : index
    %c0_9 = arith.constant 0 : index
    %11 = vector.load %arg5[%c0_8, %c0_9] : memref<1x128xf32, #tpu.memory_space<vmem>>, vector<1x128xf32>
    %cst_10 = arith.constant dense<0.000000e+00> : vector<16x128xf32>
    %12 = tpu.matmul %9, %10, %cst_10 {dimension_numbers = #tpu.dot_dimension_numbers<[1], [0], [0], [1], [0, 0, 1, 1], [], []>} : vector<16x128xbf16>, vector<128x128xbf16>, vector<16x128xf32> -> vector<16x128xf32>
    %13 = vector.broadcast %11 : vector<1x128xf32> to vector<16x128xf32>
    %14 = arith.addf %12, %13 : vector<16x128xf32>
    %cst_11 = arith.constant 0.000000e+00 : f32
    %15 = vector.broadcast %cst_11 : f32 to vector<16x128xf32>
    %16 = arith.maximumf %14, %15 : vector<16x128xf32>
    %17 = arith.truncf %16 : vector<16x128xf32> to vector<16x128xbf16>
    %c0_12 = arith.constant 0 : index
    %c0_13 = arith.constant 0 : index
    %18 = vector.load %arg6[%c0_12, %c0_13] : memref<128x128xbf16, #tpu.memory_space<vmem>>, vector<128x128xbf16>
    %c0_14 = arith.constant 0 : index
    %c0_15 = arith.constant 0 : index
    %19 = vector.load %arg7[%c0_14, %c0_15] : memref<1x128xf32, #tpu.memory_space<vmem>>, vector<1x128xf32>
    %cst_16 = arith.constant dense<0.000000e+00> : vector<16x128xf32>
    %20 = tpu.matmul %17, %18, %cst_16 {dimension_numbers = #tpu.dot_dimension_numbers<[1], [0], [0], [1], [0, 0, 1, 1], [], []>} : vector<16x128xbf16>, vector<128x128xbf16>, vector<16x128xf32> -> vector<16x128xf32>
    %21 = vector.broadcast %19 : vector<1x128xf32> to vector<16x128xf32>
    %22 = arith.addf %20, %21 : vector<16x128xf32>
    %cst_17 = arith.constant 0.000000e+00 : f32
    %23 = vector.broadcast %cst_17 : f32 to vector<16x128xf32>
    %24 = arith.maximumf %22, %23 : vector<16x128xf32>
    %c0_18 = arith.constant 0 : index
    %c0_19 = arith.constant 0 : index
    %25 = vector.load %arg8[%c0_18, %c0_19] : memref<16x128xf32, #tpu.memory_space<vmem>>, vector<16x128xf32>
    tpu.vector_store %arg8[%c0_18, %c0_19], %24 {strides = array<i32>} : memref<16x128xf32, #tpu.memory_space<vmem>>, vector<16x128xf32>,
    return
  }
  func.func @transform_0(%arg0: i32) -> (i32, i32) {
    %c0_i32 = arith.constant 0 : i32
    %c0_i32_0 = arith.constant 0 : i32
    return %arg0, %c0_i32 : i32, i32
  }
  func.func @transform_1(%arg0: i32) -> (i32, i32) {
    %c0_i32 = arith.constant 0 : i32
    %c0_i32_0 = arith.constant 0 : i32
    %c0_i32_1 = arith.constant 0 : i32
    return %c0_i32, %c0_i32_0 : i32, i32
  }
  func.func @transform_2(%arg0: i32) -> (i32, i32) {
    %c0_i32 = arith.constant 0 : i32
    %c0_i32_0 = arith.constant 0 : i32
    %c0_i32_1 = arith.constant 0 : i32
    return %c0_i32, %c0_i32_0 : i32, i32
  }
  func.func @transform_3(%arg0: i32) -> (i32, i32) {
    %c0_i32 = arith.constant 0 : i32
    %c0_i32_0 = arith.constant 0 : i32
    %c0_i32_1 = arith.constant 0 : i32
    return %c0_i32, %c0_i32_0 : i32, i32
  }
  func.func @transform_4(%arg0: i32) -> (i32, i32) {
    %c0_i32 = arith.constant 0 : i32
    %c0_i32_0 = arith.constant 0 : i32
    %c0_i32_1 = arith.constant 0 : i32
    return %c0_i32, %c0_i32_0 : i32, i32
  }
  func.func @transform_5(%arg0: i32) -> (i32, i32) {
    %c0_i32 = arith.constant 0 : i32
    %c0_i32_0 = arith.constant 0 : i32
    %c0_i32_1 = arith.constant 0 : i32
    return %c0_i32, %c0_i32_0 : i32, i32
  }
  func.func @transform_6(%arg0: i32) -> (i32, i32) {
    %c0_i32 = arith.constant 0 : i32
    %c0_i32_0 = arith.constant 0 : i32
    %c0_i32_1 = arith.constant 0 : i32
    return %c0_i32, %c0_i32_0 : i32, i32
  }
  func.func @transform_7(%arg0: i32) -> (i32, i32) {
    %c0_i32 = arith.constant 0 : i32
    %c0_i32_0 = arith.constant 0 : i32
    return %arg0, %c0_i32 : i32, i32
  }
}

</mosaic_0001>

<bundles_post_ra>
// kernel: tpu_custom_call.1
= control target key start
LH: loop header
LB: loop body
LE: loop exit
PB: predicated region body
PF: predicated region fallthrough
CT: control target
= control target key end

     0   :  { %12 = vsyncpa [#allocation3], 0  ;;  %s811_s0 = inlined_call_operand.hbm [shape: f32[8,32], index: 0, kind: input, shape index: {}]   ;;  %s812_s1 = inlined_call_operand.hbm [shape: bf16[32,128], index: 1, kind: input, shape index: {}]   ;;  %s813_s2 = inlined_call_operand.vmem [shape: f32[1,128], index: 2, kind: input, shape index: {}]   ;;  %s814_s3 = inlined_call_operand.hbm [shape: bf16[128,128], index: 3, kind: input, shape index: {}]   ;;  %s815_s4 = inlined_call_operand.vmem [shape: f32[1,128], index: 4, kind: input, shape index: {}]   ;;  %s816_s5 = inlined_call_operand.hbm [shape: bf16[128,128], index: 5, kind: input, shape index: {}]   ;;  %s817_s6 = inlined_call_operand.vmem [shape: f32[1,128], index: 6, kind: input, shape index: {}]   ;;  %s818_s7 = inlined_call_operand.hbm [shape: f32[8,128], index: 7, kind: output, shape index: {}]  }
   0x1   :  { %13 = vsyncpa [#allocation6], 0 }
   0x2   :  { %14 = vsyncpa [#allocation9], 0 }
   0x3   :  { %15 = vsyncpa [#allocation4], 0 }
   0x4   :  { %20 = vsyncadd [#allocation3], 128  ;;  %s645_s24 = smov [#allocation5]   ;;  %s527_s28 = scalar_lea.hbm %s812_s1, 256 }
   0x5   :  { %s33_s25 = sshll.u32 %s645_s24, 4  ;;  %p528_p0 = scmp.ne.s32.totalorder %s812_s1, %s527_s28  ;;  %s34_s25 = int_to_ptr.vmem [resolvable:$true] %s33_s25 }
   0x6   :  { %p531_p1 = scmp.lt.u32.totalorder %s527_s28, %s812_s1 }
   0x8   :  { %p533_p2 = pnand %p531_p1, %p528_p0 }
   0xa   :  { %536 = shalt.err (!%p533_p2)
}
   0xb   :  { %s537_s10 = scalar_lea.vmem %s34_s25, 256  ;;  %p542_p4 = scmp.lt.s32.totalorder %s34_s25, %s34_s25 }
   0xc   :  { %p538_p3 = scmp.ne.s32.totalorder %s34_s25, %s537_s10  ;;  %p543_p5 = scmp.lt.s32.totalorder %s537_s10, %s537_s10 }
   0xe   :  { %p544_p6 = por %p543_p5, %p542_p4 }
  0x10   :  { %p545_p7 = pnand %p544_p6, %p538_p3 }
  0x12   :  { %548 = shalt.err (!%p545_p7)
}
  0x13   :  { %s646_s11 = smov 64   ;;  %s647_s12 = smov 4  }
  0x14   :  { %39 = dma.hbm_to_vmem [thread:$0]  %s812_s1, 256, %s34_s25, [#allocation6], %s646_s11, %s646_s11, %s647_s12  }
  0x15   :  { %s648_s15 = smov [#allocation2]   ;;  %s549_s19 = scalar_lea.hbm %s811_s0, 128 }
  0x16   :  { %s21_s16 = sshll.u32 %s648_s15, 4  ;;  %p550_p8 = scmp.ne.s32.totalorder %s811_s0, %s549_s19  ;;  %s22_s16 = int_to_ptr.vmem [resolvable:$true] %s21_s16 }
  0x17   :  { %p553_p9 = scmp.lt.u32.totalorder %s549_s19, %s811_s0 }
  0x19   :  { %p555_p10 = pnand %p553_p9, %p550_p8 }
  0x1b   :  { %558 = shalt.err (!%p555_p10)
}
  0x1c   :  { %s559_s24 = scalar_lea.vmem %s22_s16, 128  ;;  %s563_s1 = scalar_lea.vmem %s22_s16, 256 }
  0x1d   :  { %p560_p11 = scmp.ne.s32.totalorder %s22_s16, %s559_s24  ;;  %p564_p12 = scmp.lt.s32.totalorder %s22_s16, %s22_s16 }
  0x1e   :  { %p565_p13 = scmp.lt.s32.totalorder %s563_s1, %s559_s24 }
  0x20   :  { %p566_p0 = por %p565_p13, %p564_p12 }
  0x22   :  { %p567_p1 = pnand %p566_p0, %p560_p11 }
  0x24   :  { %570 = shalt.err (!%p567_p1)
}
  0x25   :  { %s649_s25 = smov 128   ;;  %s650_s26 = smov 8  }
  0x26   :  { %27 = dma.hbm_to_vmem [thread:$0]  %s811_s0, 128, %s22_s16, [#allocation3], %s649_s25, %s649_s25, %s650_s26  }
  0x27   :  { %s651_s29 = smov [#allocation7]   ;;  %s652_s8 = smov [#allocation8]  }
  0x28   :  { %s47_s30 = sshll.u32 %s651_s29, 4  ;;  %s61_s9 = sshll.u32 %s652_s8, 4  ;;  %s48_s30 = int_to_ptr.vmem [resolvable:$true] %s47_s30  ;;  %s726_s9 = int_to_ptr.vmem [resolvable:$true] %s61_s9 }
  0x29   :  { %s571_s14 = scalar_lea.hbm %s814_s3, 1024 }
  0x2a   :  { %p572_p2 = scmp.ne.s32.totalorder %s814_s3, %s571_s14  ;;  %p575_p3 = scmp.lt.u32.totalorder %s571_s14, %s814_s3 }
  0x2c   :  { %p577_p4 = pnand %p575_p3, %p572_p2 }
  0x2e   :  { %580 = shalt.err (!%p577_p4)
}
  0x2f   :  { %s581_s0 = scalar_lea.vmem %s48_s30, 1024  ;;  %p586_p6 = scmp.lt.s32.totalorder %s48_s30, %s48_s30 }
  0x30   :  { %p582_p5 = scmp.ne.s32.totalorder %s48_s30, %s581_s0  ;;  %p587_p7 = scmp.lt.s32.totalorder %s581_s0, %s581_s0 }
  0x32   :  { %p588_p8 = por %p587_p7, %p586_p6 }
  0x34   :  { %p589_p9 = pnand %p588_p8, %p582_p5 }
  0x36   :  { %592 = shalt.err (!%p589_p9)
}
  0x37   :  { %53 = dma.hbm_to_vmem [thread:$0]  %s814_s3, 1024, %s48_s30, [#allocation6], %s646_s11, %s646_s11, %s647_s12  }
  0x38   :  { %s593_s23 = scalar_lea.hbm %s816_s5, 1024 }
  0x39   :  { %p594_p10 = scmp.ne.s32.totalorder %s816_s5, %s593_s23  ;;  %p597_p11 = scmp.lt.u32.totalorder %s593_s23, %s816_s5 }
  0x3b   :  { %p599_p12 = pnand %p597_p11, %p594_p10 }
  0x3d   :  { %602 = shalt.err (!%p599_p12)
}
  0x3e   :  { %s603_s29 = scalar_lea.vmem %s726_s9, 1024  ;;  %p608_p0 = scmp.lt.s32.totalorder %s726_s9, %s726_s9 }
  0x3f   :  { %p604_p13 = scmp.ne.s32.totalorder %s726_s9, %s603_s29  ;;  %p609_p1 = scmp.lt.s32.totalorder %s603_s29, %s603_s29 }
  0x41   :  { %p610_p2 = por %p609_p1, %p608_p0 }
  0x43   :  { %p611_p3 = pnand %p610_p2, %p604_p13 }
  0x45   :  { %614 = shalt.err (!%p611_p3)
}
  0x46   :  { %67 = dma.hbm_to_vmem [thread:$0]  %s816_s5, 1024, %s726_s9, [#allocation9], %s646_s11, %s646_s11, %s647_s12  }
  0x47   :  { %637 = dma.done.wait [#allocation3], 256  }
  0x48   :  { %638 = vsyncadd [#allocation3], 4294967040 }
  0x49   :  { %639 = dma.done.wait [#allocation6], 1280  }
  0x4a   :  { %640 = vsyncadd [#allocation6], 4294966016 }
  0x4b   :  { %641 = dma.done.wait [#allocation9], 1024  }
  0x4c   :  { %642 = vsyncadd [#allocation9], 4294966272  ;;  %v653_v0 = vmov 0.0   ;;  %vm654_vm0 = vmmov 0   ;;  %v509_v1 = vld [vmem:[#allocation5] sm:$0xff]   ;;  %v510_v2 = vld [vmem:[#allocation5 + $0x8] sm:$0xff]  }
  0x4d   :  { %450 = vmatprep.subr.bf16.mxu0 %v653_v0  ;;  %454 = vmatprep.mubr.msk.bf16.mxu0 %vm654_vm0, %v653_v0  ;;  %v83_v3 = vld [vmem:[#allocation2] sm:$0xff]  ;;  %v84_v4 = vld [vmem:[#allocation2 + $0x8] sm:$0xff]  ;;  %vm109_vm1 = vcmask 261120   ;;  %v513_v8 = vld [vmem:[#allocation7 + $0x10] sm:$0xff]  }
  0x4e   :  { %458 = vmatprep.subr.bf16.mxu1 %v653_v0  ;;  %474 = vmatprep.mubr.msk.bf16.mxu1 %vm654_vm0, %v653_v0  ;;  %v511_v5 = vld [vmem:[#allocation7] sm:$0xff]   ;;  %v85_v6 = vpack.c.bf16 %v84_v4, %v83_v3  ;;  %v512_v7 = vld [vmem:[#allocation7 + $0x8] sm:$0xff]   ;;  %v514_v9 = vld [vmem:[#allocation7 + $0x18] sm:$0xff]  }
  0x4f   :  { %451 = vmatpush3.bf16.msra.mxu0 %v509_v1  ;;  %459 = vmatpush3.bf16.msra.mxu1 %v511_v5  ;;  %v515_v10 = vld [vmem:[#allocation7 + $0x20] sm:$0xff]   ;;  %v516_v11 = vld [vmem:[#allocation7 + $0x28] sm:$0xff]   ;;  %v517_v12 = vld [vmem:[#allocation7 + $0x30] sm:$0xff]  }
  0x50   :  { %452 = vmatprep.subr.bf16.mxu0 %v653_v0  ;;  %460 = vmatprep.subr.bf16.mxu1 %v653_v0  ;;  %v518_v13 = vld [vmem:[#allocation7 + $0x38] sm:$0xff]   ;;  %v519_v14 = vld [vmem:[#allocation8] sm:$0xff]   ;;  %v520_v15 = vld [vmem:[#allocation8 + $0x8] sm:$0xff]  }
  0x51   :  { %v521_v16 = vld [vmem:[#allocation8 + $0x10] sm:$0xff]   ;;  %v522_v17 = vld [vmem:[#allocation8 + $0x18] sm:$0xff]   ;;  %v523_v18 = vld [vmem:[#allocation8 + $0x20] sm:$0xff]  }
  0x52   :  { %v524_v19 = vld [vmem:[#allocation8 + $0x28] sm:$0xff]   ;;  %v407_v20 = vld [vmem:[%s813_s2] ss:$0 sm:$0xff]  ;;  %v525_v30 = vld [vmem:[#allocation8 + $0x30] sm:$0xff]  }
  0x53   :  { %453 = vmatpush3.bf16.msra.mxu0 %v510_v2  ;;  %461 = vmatpush3.bf16.msra.mxu1 %v512_v7  ;;  %v526_v31 = vld [vmem:[#allocation8 + $0x38] sm:$0xff]   ;;  %v411_v32 = vld [vmem:[%s815_s4] ss:$0 sm:$0xff] }
  0x54   :  { %478 = vmatprep.subr.bf16.mxu0 %v653_v0  ;;  %462 = vmatprep.subr.bf16.mxu1 %v653_v0  ;;  %v420_v42 = vld [vmem:[%s817_s6] ss:$0 sm:$0xff] }
  0x56   :  { %455 = vmatmul.mubr.msk.bf16.vlgmr.msra.gmra.mrb[0].mxu0 %vm109_vm1, %v85_v6 }
  0x57   :  { %494 = vmatprep.mubr.msk.bf16.mxu0 %vm654_vm0, %v653_v0  ;;  %463 = vmatpush3.bf16.msra.mxu1 %v513_v8 }
  0x58   :  { %464 = vmatprep.subr.bf16.mxu1 %v653_v0  ;;  %479 = vmatpush3.bf16.msra.mxu0 %v519_v14 }
  0x59   :  { %480 = vmatprep.subr.bf16.mxu0 %v653_v0 }
  0x5b   :  { %465 = vmatpush3.bf16.msra.mxu1 %v514_v9 }
  0x5c   :  { %466 = vmatprep.subr.bf16.mxu1 %v653_v0  ;;  %481 = vmatpush3.bf16.msra.mxu0 %v520_v15 }
  0x5d   :  { %482 = vmatprep.subr.bf16.mxu0 %v653_v0 }
  0x5f   :  { %467 = vmatpush3.bf16.msra.mxu1 %v515_v10 }
  0x60   :  { %468 = vmatprep.subr.bf16.mxu1 %v653_v0  ;;  %483 = vmatpush3.bf16.msra.mxu0 %v521_v16 }
  0x61   :  { %484 = vmatprep.subr.bf16.mxu0 %v653_v0 }
  0x63   :  { %469 = vmatpush3.bf16.msra.mxu1 %v516_v11 }
  0x64   :  { %470 = vmatprep.subr.bf16.mxu1 %v653_v0  ;;  %485 = vmatpush3.bf16.msra.mxu0 %v522_v17 }
  0x65   :  { %486 = vmatprep.subr.bf16.mxu0 %v653_v0 }
  0x67   :  { %471 = vmatpush3.bf16.msra.mxu1 %v517_v12 }
  0x68   :  { %472 = vmatprep.subr.bf16.mxu1 %v653_v0  ;;  %487 = vmatpush3.bf16.msra.mxu0 %v523_v18 }
  0x69   :  { %488 = vmatprep.subr.bf16.mxu0 %v653_v0 }
  0x6b   :  { %473 = vmatpush3.bf16.msra.mxu1 %v518_v13 }
  0x6c   :  { %489 = vmatpush3.bf16.msra.mxu0 %v524_v19 }
  0x6d   :  { %490 = vmatprep.subr.bf16.mxu0 %v653_v0 }
  0x70   :  { %491 = vmatpush3.bf16.msra.mxu0 %v525_v30 }
  0x71   :  { %492 = vmatprep.subr.bf16.mxu0 %v653_v0 }
  0x74   :  { %493 = vmatpush3.bf16.msra.mxu0 %v526_v31 }
 0x129   :  { %v147_v21 = vpop.f32.mrb[0].mxu0 }
 0x12a   :  { %v148_v22 = vadd.f32 %v407_v20, %v147_v21  ;;  %v456_v23 = vpop.f32.mrb[1].mxu0 }
 0x12b   :  { %v150_v24 = vpop.f32.mrb[2].mxu0 }
 0x12c   :  { %v151_v25 = vadd.f32 %v407_v20, %v150_v24  ;;  %v457_v26 = vpop.f32.mrb[3].mxu0  ;;  %v154_v27 = vmax.f32 %v148_v22, 0.0 }
 0x12e   :  { %v155_v28 = vmax.f32 %v151_v25, 0.0 }
 0x130   :  { %v156_v29 = vpack.c.bf16 %v155_v28, %v154_v27 }
 0x132   :  { %475 = vmatmul.mubr.bf16.vlgmr.msra.gmra.mrb[0].mxu1 %v156_v29 }
 0x205   :  { %v262_v33 = vpop.f32.mrb[0].mxu1 }
 0x206   :  { %v263_v34 = vadd.f32 %v411_v32, %v262_v33  ;;  %v476_v35 = vpop.f32.mrb[1].mxu1 }
 0x207   :  { %v265_v36 = vpop.f32.mrb[2].mxu1 }
 0x208   :  { %v266_v37 = vadd.f32 %v411_v32, %v265_v36  ;;  %v477_v38 = vpop.f32.mrb[3].mxu1  ;;  %v269_v39 = vmax.f32 %v263_v34, 0.0 }
 0x20a   :  { %v270_v40 = vmax.f32 %v266_v37, 0.0 }
 0x20c   :  { %v271_v41 = vpack.c.bf16 %v270_v40, %v269_v39 }
 0x20e   :  { %495 = vmatmul.mubr.bf16.vlgmr.msra.gmra.mrb[4].mxu0 %v271_v41 }
 0x2e1   :  { %v377_v43 = vpop.f32.mrb[4].mxu0 }
 0x2e2   :  { %v378_v44 = vadd.f32 %v420_v42, %v377_v43  ;;  %v496_v45 = vpop.f32.mrb[5].mxu0 }
 0x2e3   :  { %v380_v46 = vpop.f32.mrb[6].mxu0 }
 0x2e4   :  { %v384_v47 = vmax.f32 %v378_v44, 0.0  ;;  %v381_v48 = vadd.f32 %v420_v42, %v380_v46  ;;  %v497_v49 = vpop.f32.mrb[7].mxu0 }
 0x2e6   :  { %386 = vst [vmem:[#allocation10] sm:$0xff] %v384_v47  ;;  %v385_v50 = vmax.f32 %v381_v48, 0.0 }
 0x2e8   :  { %387 = vst [vmem:[#allocation10 + $0x8] sm:$0xff] %v385_v50 }
 0x2e9   :  { %392 = vsyncadd [#allocation4], 128  ;;  %s655_s4 = smov [#allocation10]  }
 0x2ea   :  { %s393_s10 = sshll.u32 %s655_s4, 4  ;;  %s394_s10 = int_to_ptr.vmem [resolvable:$true] %s393_s10 }
 0x2eb   :  { %s615_s13 = scalar_lea.vmem %s394_s10, 128  ;;  %s619_s14 = scalar_lea.vmem %s394_s10, 256 }
 0x2ec   :  { %p616_p4 = scmp.ne.s32.totalorder %s394_s10, %s615_s13  ;;  %p620_p5 = scmp.lt.s32.totalorder %s394_s10, %s394_s10 }
 0x2ed   :  { %p621_p6 = scmp.lt.s32.totalorder %s619_s14, %s615_s13 }
 0x2ef   :  { %p622_p7 = por %p621_p6, %p620_p5 }
 0x2f1   :  { %p623_p8 = pnand %p622_p7, %p616_p4 }
 0x2f3   :  { %626 = shalt.err (!%p623_p8)
}
 0x2f4   :  { %s627_s17 = scalar_lea.hbm %s818_s7, 128 }
 0x2f5   :  { %p628_p9 = scmp.ne.s32.totalorder %s818_s7, %s627_s17  ;;  %p631_p10 = scmp.lt.u32.totalorder %s627_s17, %s818_s7 }
 0x2f7   :  { %p633_p11 = pnand %p631_p10, %p628_p9 }
 0x2f9   :  { %636 = shalt.err (!%p633_p11)
}
 0x2fa   :  { %399 = dma.vmem_to_hbm [thread:$0]  %s394_s10, 128, %s818_s7, [#allocation4], %s649_s25, %s649_s25, %s650_s26  }
 0x2fb   :  { %643 = dma.done.wait [#allocation4], 256  }
 0x2fc   :  { %644 = vsyncadd [#allocation4], 4294967040 }
 0x2fd   :  { %403 = vsyncpa [#allocation3], 1 }
 0x2fe   :  { %404 = vsyncpa [#allocation6], 1 }
 0x2ff   :  { %405 = vsyncpa [#allocation9], 1 }
 0x300   :  { %406 = vsyncpa [#allocation4], 1 }

</bundles_post_ra>
